<compile_context>
chip_gen: v5e
topology: v5e:2x2
jax: 0.10.0
libtpu: 0.0.40
codegen_flags: <defaults>
</compile_context>

<pallas_src>
import functools

import jax
import jax.numpy as jnp
from jax.experimental import pallas as pl
from jax.experimental.pallas import tpu as pltpu


def _round_up(x, m):
    return (x + m - 1) // m * m


def reward_criterion_kernel(inp_ref, seq_ref, rew_ref, out_ref, acc_ref, *,
                            batch, tb):
    pid = pl.program_id(0)

    @pl.when(pid == 0)
    def _init():
        acc_ref[0] = jnp.float32(0.0)   # numerator accumulator
        acc_ref[1] = jnp.float32(0.0)   # denominator accumulator

    inp = inp_ref[...].astype(jnp.float32)   # (TB, T) log-probs
    seq = seq_ref[...]                       # (TB, T) int32 token ids
    rew = rew_ref[...].astype(jnp.float32)   # (TB, T) rewards

    TB, T = seq.shape
    col = jax.lax.broadcasted_iota(jnp.int32, (TB, T), 1)
    row = jax.lax.broadcasted_iota(jnp.int32, (TB, T), 0) + pid * tb

    # Shifted mask: column 0 is forced to 1; column t uses seq[:, t-1].
    # pltpu.roll is circular (column 0 receives seq[:, T-1]) -> overridden by
    # the col == 0 branch of the fused select below.
    seq_shifted = pltpu.roll(seq, shift=1, axis=1)
    keep = ((col == 0) | (seq_shifted > 0)) & (row < batch)

    acc_ref[0] += jnp.sum(jnp.where(keep, -inp * rew, jnp.float32(0.0)))
    acc_ref[1] += jnp.sum(keep.astype(jnp.float32))

    @pl.when(pid == pl.num_programs(0) - 1)
    def _finalize():
        # den >= batch (column 0 always counts), so no divide-by-zero.
        out_ref[0, 0] = acc_ref[0] / acc_ref[1]


def reward_criterion(inp, seq, reward, *, tb=None):
    """inp: (B,T) float, seq: (B,T) int, reward: (B,T) float -> scalar f32."""
    B, T = seq.shape
    seq = seq.astype(jnp.int32)

    # Tile over batch only; rows per tile must satisfy the sublane constraint.
    if tb is None:
        tb = min(_round_up(B, 8), 512)
    tb = max(8, _round_up(tb, 8))

    B_pad = _round_up(B, tb)
    if B_pad != B:
        pad = ((0, B_pad - B), (0, 0))
        inp = jnp.pad(inp, pad)
        seq = jnp.pad(seq, pad)
        reward = jnp.pad(reward, pad)

    grid = (B_pad // tb,)
    kernel = functools.partial(reward_criterion_kernel, batch=B, tb=tb)

    out = pl.pallas_call(
        kernel,
        out_shape=jax.ShapeDtypeStruct((1, 1), jnp.float32),
        grid=grid,
        in_specs=[
            pl.BlockSpec((tb, T), lambda i: (i, 0)),
            pl.BlockSpec((tb, T), lambda i: (i, 0)),
            pl.BlockSpec((tb, T), lambda i: (i, 0)),
        ],
        out_specs=pl.BlockSpec(memory_space=pltpu.MemorySpace.SMEM),
        scratch_shapes=[pltpu.SMEM((2,), jnp.float32)],
        compiler_params=pltpu.CompilerParams(
            dimension_semantics=("arbitrary",)),
    )(inp, seq, reward)
    return out[0, 0]


def reward_criterion_ref(inp, seq, reward):
    """Pure-JAX reference mirroring the PyTorch forward."""
    mask = (seq > 0).astype(jnp.float32)
    mask = jnp.concatenate(
        [jnp.ones((mask.shape[0], 1), jnp.float32), mask[:, :-1]], axis=1)
    out = -inp.astype(jnp.float32) * reward.astype(jnp.float32) * mask
    return jnp.sum(out) / jnp.sum(mask)


if __name__ == "__main__":
    key = jax.random.PRNGKey(0)

    # Case 1: docstring-sized inputs (B=2, T=8); exercises batch padding.
    k1, k2, k3, k4, k5, k6 = jax.random.split(key, 6)
    B, T = 2, 8
    logp = -jax.random.uniform(k1, (B, T), jnp.float32, minval=0.1, maxval=5.0)
    seq = jax.random.randint(k2, (B, T), minval=0, maxval=10, dtype=jnp.int32)
    reward = jax.random.normal(k3, (B, T), jnp.float32)

    loss = reward_criterion(logp, seq, reward)
    jax.block_until_ready(loss)
    ref = reward_criterion_ref(logp, seq, reward)
    assert jnp.allclose(loss, ref, rtol=1e-5, atol=1e-5), (loss, ref)

    # Case 2: larger, lane-dense inputs; exercises a multi-step grid with the
    # cross-step accumulator (init / finalize under pl.when).
    B2, T2 = 48, 128
    logp2 = -jax.random.uniform(k4, (B2, T2), jnp.float32, minval=0.1, maxval=5.0)
    seq2 = jax.random.randint(k5, (B2, T2), minval=0, maxval=4, dtype=jnp.int32)
    reward2 = jax.random.normal(k6, (B2, T2), jnp.float32)

    loss2 = reward_criterion(logp2, seq2, reward2, tb=16)   # grid = (3,)
    jax.block_until_ready(loss2)
    ref2 = reward_criterion_ref(logp2, seq2, reward2)
    assert jnp.allclose(loss2, ref2, rtol=1e-5, atol=1e-5), (loss2, ref2)

    print("KERNEL_OK")
</pallas_src>

<mosaic_0001>
module attributes {stable_mosaic.version = 11 : i64} {
  func.func @reward_criterion_kernel(%arg0: i32, %arg1: memref<8x8xf32, #tpu.memory_space<vmem>>, %arg2: memref<8x8xi32, #tpu.memory_space<vmem>>, %arg3: memref<8x8xf32, #tpu.memory_space<vmem>>, %arg4: memref<1x1xf32, #tpu.memory_space<smem>>, %arg5: memref<2xf32, #tpu.memory_space<smem>>) attributes {dimension_semantics = [#tpu.dimension_semantics<arbitrary>], iteration_bounds = array<i64: 1>, scalar_prefetch = 0 : i64, scratch_operands = 1 : i64, tpu.core_type = #tpu.core_type<tc>, window_params = [{transform_indices = @transform_0, window_bounds = array<i64: 8, 8>}, {transform_indices = @transform_1, window_bounds = array<i64: 8, 8>}, {transform_indices = @transform_2, window_bounds = array<i64: 8, 8>}, {transform_indices = @transform_3, window_bounds = array<i64: 1, 1>}]} {
    %c0_i32 = arith.constant 0 : i32
    %0 = arith.cmpi eq, %arg0, %c0_i32 : i32
    %1 = arith.extui %0 : i1 to i32
    %c0_i32_0 = arith.constant 0 : i32
    %2 = arith.cmpi ne, %1, %c0_i32_0 : i32
    scf.if %2 {
      %cst_16 = arith.constant 0.000000e+00 : f32
      %c0_17 = arith.constant 0 : index
      %44 = memref.load %arg5[%c0_17] : memref<2xf32, #tpu.memory_space<smem>>
      memref.store %cst_16, %arg5[%c0_17] : memref<2xf32, #tpu.memory_space<smem>>
      %cst_18 = arith.constant 0.000000e+00 : f32
      %c1_19 = arith.constant 1 : index
      %45 = memref.load %arg5[%c1_19] : memref<2xf32, #tpu.memory_space<smem>>
      memref.store %cst_18, %arg5[%c1_19] : memref<2xf32, #tpu.memory_space<smem>>
    } else {
    }
    %c0 = arith.constant 0 : index
    %c0_1 = arith.constant 0 : index
    %3 = vector.load %arg1[%c0, %c0_1] : memref<8x8xf32, #tpu.memory_space<vmem>>, vector<8x8xf32>
    %c0_2 = arith.constant 0 : index
    %c0_3 = arith.constant 0 : index
    %4 = vector.load %arg2[%c0_2, %c0_3] : memref<8x8xi32, #tpu.memory_space<vmem>>, vector<8x8xi32>
    %c0_4 = arith.constant 0 : index
    %c0_5 = arith.constant 0 : index
    %5 = vector.load %arg3[%c0_4, %c0_5] : memref<8x8xf32, #tpu.memory_space<vmem>>, vector<8x8xf32>
    %6 = tpu.iota {dimensions = array<i32: 1>} : vector<8x8xi32>
    %7 = tpu.iota {dimensions = array<i32: 0>} : vector<8x8xi32>
    %c8_i32 = arith.constant 8 : i32
    %8 = arith.muli %arg0, %c8_i32 : i32
    %9 = vector.broadcast %8 : i32 to vector<8x8xi32>
    %10 = arith.addi %7, %9 : vector<8x8xi32>
    %c1_i32 = arith.constant 1 : i32
    %11 = tpu.dynamic_rotate %4 by %c1_i32 dim 1 : vector<8x8xi32>, i32 -> vector<8x8xi32>
    %c0_i32_6 = arith.constant 0 : i32
    %12 = vector.broadcast %c0_i32_6 : i32 to vector<8x8xi32>
    %13 = arith.cmpi eq, %6, %12 : vector<8x8xi32>
    %c0_i32_7 = arith.constant 0 : i32
    %14 = vector.broadcast %c0_i32_7 : i32 to vector<8x8xi32>
    %15 = arith.cmpi sgt, %11, %14 : vector<8x8xi32>
    %16 = arith.ori %13, %15 : vector<8x8xi1>
    %c2_i32 = arith.constant 2 : i32
    %17 = vector.broadcast %c2_i32 : i32 to vector<8x8xi32>
    %18 = arith.cmpi slt, %10, %17 : vector<8x8xi32>
    %19 = arith.andi %16, %18 : vector<8x8xi1>
    %c0_8 = arith.constant 0 : index
    %20 = memref.load %arg5[%c0_8] : memref<2xf32, #tpu.memory_space<smem>>
    %cst = arith.constant 0.000000e+00 : f32
    %21 = vector.broadcast %cst : f32 to vector<8x8xf32>
    %22 = arith.subf %21, %3 : vector<8x8xf32>
    %23 = arith.mulf %22, %5 : vector<8x8xf32>
    %cst_9 = arith.constant 0.000000e+00 : f32
    %24 = vector.broadcast %cst_9 : f32 to vector<8x8xf32>
    %25 = arith.select %19, %23, %24 : vector<8x8xi1>, vector<8x8xf32>
    %26 = vector.shape_cast %25 : vector<8x8xf32> to vector<1x8x8xf32>
    %cst_10 = arith.constant dense<0.000000e+00> : vector<1xf32>
    %27 = vector.multi_reduction <add>, %26, %cst_10 [1, 2] : vector<1x8x8xf32> to vector<1xf32>
    %28 = vector.shape_cast %27 : vector<1xf32> to vector<1x1x1xf32>
    %29 = vector.extract %28[0, 0, 0] : f32 from vector<1x1x1xf32>
    %30 = arith.addf %20, %29 : f32
    %c0_11 = arith.constant 0 : index
    %31 = memref.load %arg5[%c0_11] : memref<2xf32, #tpu.memory_space<smem>>
    memref.store %30, %arg5[%c0_11] : memref<2xf32, #tpu.memory_space<smem>>
    %c1 = arith.constant 1 : index
    %32 = memref.load %arg5[%c1] : memref<2xf32, #tpu.memory_space<smem>>
    %33 = arith.extui %19 : vector<8x8xi1> to vector<8x8xi32>
    %34 = arith.sitofp %33 : vector<8x8xi32> to vector<8x8xf32>
    %35 = vector.shape_cast %34 : vector<8x8xf32> to vector<1x8x8xf32>
    %cst_12 = arith.constant dense<0.000000e+00> : vector<1xf32>
    %36 = vector.multi_reduction <add>, %35, %cst_12 [1, 2] : vector<1x8x8xf32> to vector<1xf32>
    %37 = vector.shape_cast %36 : vector<1xf32> to vector<1x1x1xf32>
    %38 = vector.extract %37[0, 0, 0] : f32 from vector<1x1x1xf32>
    %39 = arith.addf %32, %38 : f32
    %c1_13 = arith.constant 1 : index
    %40 = memref.load %arg5[%c1_13] : memref<2xf32, #tpu.memory_space<smem>>
    memref.store %39, %arg5[%c1_13] : memref<2xf32, #tpu.memory_space<smem>>
    %c0_i32_14 = arith.constant 0 : i32
    %41 = arith.cmpi eq, %arg0, %c0_i32_14 : i32
    %42 = arith.extui %41 : i1 to i32
    %c0_i32_15 = arith.constant 0 : i32
    %43 = arith.cmpi ne, %42, %c0_i32_15 : i32
    scf.if %43 {
      %c0_16 = arith.constant 0 : index
      %44 = memref.load %arg5[%c0_16] : memref<2xf32, #tpu.memory_space<smem>>
      %c1_17 = arith.constant 1 : index
      %45 = memref.load %arg5[%c1_17] : memref<2xf32, #tpu.memory_space<smem>>
      %46 = arith.divf %44, %45 : f32
      %c0_18 = arith.constant 0 : index
      %c0_19 = arith.constant 0 : index
      %47 = memref.load %arg4[%c0_18, %c0_19] : memref<1x1xf32, #tpu.memory_space<smem>>
      memref.store %46, %arg4[%c0_18, %c0_19] : memref<1x1xf32, #tpu.memory_space<smem>>
    } else {
    }
    return
  }
  func.func @transform_0(%arg0: i32) -> (i32, i32) {
    %c0_i32 = arith.constant 0 : i32
    %c0_i32_0 = arith.constant 0 : i32
    return %arg0, %c0_i32 : i32, i32
  }
  func.func @transform_1(%arg0: i32) -> (i32, i32) {
    %c0_i32 = arith.constant 0 : i32
    %c0_i32_0 = arith.constant 0 : i32
    return %arg0, %c0_i32 : i32, i32
  }
  func.func @transform_2(%arg0: i32) -> (i32, i32) {
    %c0_i32 = arith.constant 0 : i32
    %c0_i32_0 = arith.constant 0 : i32
    return %arg0, %c0_i32 : i32, i32
  }
  func.func @transform_3(%arg0: i32) -> (i32, i32) {
    %c0_i32 = arith.constant 0 : i32
    %c0_i32_0 = arith.constant 0 : i32
    %c0_i32_1 = arith.constant 0 : i32
    return %c0_i32, %c0_i32_0 : i32, i32
  }
}

</mosaic_0001>

<bundles_post_ra>
// kernel: tpu_custom_call.1
= control target key start
LH: loop header
LB: loop body
LE: loop exit
PB: predicated region body
PF: predicated region fallthrough
CT: control target
= control target key end

     0   :  { %8 = vsyncpa [#allocation4], 0  ;;  %s314_s0 = inlined_call_operand.hbm [shape: f32[8,8], index: 0, kind: input, shape index: {}]   ;;  %s315_s1 = inlined_call_operand.hbm [shape: s32[8,8], index: 1, kind: input, shape index: {}]   ;;  %s316_s2 = inlined_call_operand.hbm [shape: f32[8,8], index: 2, kind: input, shape index: {}]   ;;  %s317_s3 = inlined_call_operand.hbm [shape: f32[1,1], index: 3, kind: output, shape index: {}]  }
   0x1   :  { %9 = vsyncpa [#allocation7], 0  ;;  %s27_s14 = sshll.u32 %s315_s1, 4  ;;  %s28_s14 = int_to_ptr.hbm [resolvable:$true] %s27_s14 }
   0x2   :  { %10 = vsyncpa [#allocation5], 0  ;;  %s274_s15 = smov [#allocation6]   ;;  %s16_s19 = sshll.u32 %s314_s0, 4  ;;  %s17_s19 = int_to_ptr.hbm [resolvable:$true] %s16_s19 }
   0x3   :  { %s29_s16 = sshll.u32 %s274_s15, 4  ;;  %s275_s20 = smov [#allocation3]   ;;  %s30_s16 = int_to_ptr.vmem [resolvable:$true] %s29_s16 }
   0x4   :  { %32 = dma.hbm_to_vmem [thread:$0]  %s28_s14, 128, %s30_s16, [#allocation7]  }
   0x5   :  { %s18_s21 = sshll.u32 %s275_s20, 4  ;;  %s38_s24 = sshll.u32 %s316_s2, 4  ;;  %s19_s21 = int_to_ptr.vmem [resolvable:$true] %s18_s21  ;;  %s39_s24 = int_to_ptr.hbm [resolvable:$true] %s38_s24 }
   0x6   :  { %21 = dma.hbm_to_vmem [thread:$0]  %s17_s19, 128, %s19_s21, [#allocation4]  }
   0x7   :  { %s276_s1 = smov [#allocation8]  }
   0x8   :  { %s40_s25 = sshll.u32 %s276_s1, 4  ;;  %s41_s25 = int_to_ptr.vmem [resolvable:$true] %s40_s25 }
   0x9   :  { %43 = dma.hbm_to_vmem [thread:$0]  %s39_s24, 128, %s41_s25, [#allocation7]  }
   0xa   :  { %268 = dma.done.wait [#allocation4], 128  }
   0xb   :  { %269 = vsyncadd [#allocation4], 4294967168 }
   0xc   :  { %270 = dma.done.wait [#allocation7], 256  }
   0xd   :  { %271 = vsyncadd [#allocation7], 4294967040  ;;  %v65_v0 = vld [vmem:[#allocation6] sm:$0xff]  ;;  %s277_s0 = smov 8   ;;  %vm74_vm0 = vcmask 1047616   ;;  %v278_v5 = vmov 0   ;;  %v67_v7 = vlaneseq }
   0xe   :  { %75 = vrot.lane.b32.xlu0 %v65_v0, %s277_s0  ;;  %s279_s2 = smov 121   ;;  %v64_v8 = vld [vmem:[#allocation3] sm:$0xff]  ;;  %v66_v12 = vld [vmem:[#allocation8] sm:$0xff]  ;;  %vm94_vm6 = vcmask 64512   ;;  %v280_v15 = vmov 0.0   ;;  %s153_s30 = sshll.u32 %s317_s3, 4  ;;  %s154_s30 = int_to_ptr.hbm [resolvable:$true] %s153_s30 }
   0xf   :  { %v68_v9 = vand.u32 127, %v67_v7  ;;  %v70_v10 = vshrl.u32 %v67_v7, 7  ;;  %v91_v11 = vsub.f32 0.0, %v64_v8  ;;  %s281_s6 = smov [#allocation9]  }
  0x11   :  { %vm81_vm2 = vcmp.eq.s32.totalorder %v68_v9, 0  ;;  %vm88_vm3 = vcmp.lt.s32.totalorder %v70_v10, 2  ;;  %v92_v14 = vmul.f32 %v91_v11, %v66_v12 }
  0x80   :  { %v76_v1 = vpop.permute.xlu0 %75 }
  0x81   :  { %v77_v2 = vsel %vm74_vm0, %v76_v1, %v65_v0 }
  0x82   :  { %78 = vrot.lane.b32.xlu0 %v77_v2, %s277_s0 }
  0xf4   :  { %v79_v3 = vpop.permute.xlu0 %78 }
  0xf5   :  { %v80_v4 = vsel %vm74_vm0, %v79_v3, %v65_v0 }
  0xf6   :  { %vm82_vm1 = vcmp.gt.s32.totalorder %v80_v4, 0 }
  0xf7   :  { %v83_v6 = vsel %vm82_vm1, 1, %v278_v5 }
  0xf8   :  { %84 = vrot.lane.b32.xlu1 %v83_v6, %s279_s2 }
 0x16a   :  { %v85_v13 = vpop.permute.xlu1 %84 }
 0x16b   :  { %vm86_vm4 = vcmp.ne.s32.totalorder %v85_v13, 0 }
 0x16c   :  { %vm87_vm5 = vmor %vm81_vm2, %vm86_vm4 }
 0x16d   :  { %vm89_vm7 = vmand %vm87_vm5, %vm88_vm3 }
 0x16e   :  { %v166_v16 = vsel %vm89_vm7, 1.0, %v280_v15  ;;  %v93_v17 = vsel %vm89_vm7, %v92_v14, 0.0 }
 0x16f   :  { %v111_v18 = vsel %vm94_vm6, %v166_v16, 0.0  ;;  %v95_v19 = vsel %vm94_vm6, %v93_v17, 0.0 }
 0x170   :  { %112 = vadd.xlane.f32.xlu2 %v111_v18  ;;  %96 = vadd.xlane.f32.xlu1 %v95_v19 }
 0x1e3   :  { %v113_v20 = vpop.xlane.xlu2 %112  ;;  %v97_v21 = vpop.xlane.xlu1 %96 }
 0x1e4   :  { %v114_v22 = vrot.slane %v113_v20, 4  ;;  %v98_v23 = vrot.slane %v97_v21, 4 }
 0x1e6   :  { %v115_v24 = vadd.f32 %v114_v22, %v113_v20  ;;  %v99_v25 = vadd.f32 %v98_v23, %v97_v21 }
 0x1e8   :  { %v116_v26 = vrot.slane %v115_v24, 2  ;;  %v100_v27 = vrot.slane %v99_v25, 2 }
 0x1ea   :  { %v117_v28 = vadd.f32 %v116_v26, %v115_v24  ;;  %v101_v29 = vadd.f32 %v100_v27, %v99_v25 }
 0x1ec   :  { %v102_v30 = vrot.slane %v101_v29, 1  ;;  %v118_v31 = vrot.slane %v117_v28, 1 }
 0x1ee   :  { %v103_v32 = vadd.f32 %v102_v30, %v101_v29  ;;  %v119_v33 = vadd.f32 %v118_v31, %v117_v28 }
 0x1f0   :  { %168 = vpush %v103_v32 }
 0x1f1   :  { %170 = vpush %v119_v33 }
 0x221   :  { %s169_s26 = spop %168 }
 0x222   :  { %s171_s27 = spop %170 }
 0x223   :  { %v129_v34 = vstv %s171_s27 }
 0x224   :  { %182 = vrcp.f32 %v129_v34  ;;  %v141_v38 = vand.u32 2147483648, %v129_v34  ;;  %v139_v40 = vand.u32 2147483647, %v129_v34  ;;  %vm135_vm9 = vweird.f32 %v129_v34 }
 0x226   :  { %v142_v42 = vor.u32 1.1754944e-38, %v141_v38  ;;  %vm140_vm11 = vcmp.eq.f32.partialorder %v139_v40, 8.507059e+37 }
 0x22a   :  { %v183_v35 = vpop.eup %182 }
 0x22b   :  { %v131_v36 = vmul.f32 %v183_v35, %v129_v34  ;;  %vm136_vm8 = vweird.f32 %v183_v35 }
 0x22c   :  { %vm137_vm10 = vmor %vm135_vm9, %vm136_vm8 }
 0x22d   :  { %v132_v37 = vsub.f32 1.0, %v131_v36 }
 0x22f   :  { %v133_v39 = vmul.f32 %v183_v35, %v132_v37 }
 0x231   :  { %v134_v41 = vadd.f32 %v183_v35, %v133_v39 }
 0x233   :  { %v138_v43 = vsel %vm137_vm10, %v183_v35, %v134_v41 }
 0x234   :  { %v143_v44 = vsel %vm140_vm11, %v142_v42, %v138_v43 }
 0x235   :  { %172 = vpush %v143_v44 }
 0x266   :  { %s173_s4 = spop %172 }
 0x267   :  { %s145_s5 = smul.f32 %s173_s4, %s169_s26 }
 0x269   :  { %147 = sst [smem:[#allocation9]] %s145_s5 }
 0x26a   :  { %156 = dma.smem_to_hbm %s281_s6, 16, %s154_s30, [#allocation5]  }
 0x26b   :  { %272 = dma.done.wait [#allocation5], 16  }
 0x26c   :  { %273 = vsyncadd [#allocation5], 4294967280 }
 0x26d   :  { %161 = sfence }
 0x26e   :  { %162 = vsyncpa [#allocation4], 1 }
 0x26f   :  { %163 = vsyncpa [#allocation7], 1 }
 0x270   :  { %164 = vsyncpa [#allocation5], 1 }

</bundles_post_ra>
